<compile_context>
chip_gen: v6e
topology: v6e:2x2x1
jax: 0.10.0
libtpu: 0.0.40
codegen_flags: <defaults>
</compile_context>

<pallas_src>
import jax
import jax.numpy as jnp
from jax.experimental import pallas as pl
from jax.experimental.pallas import tpu as pltpu


def add_kernel(a_ref, b_ref, o_ref):
    # Whole-array elementwise add on the VPU.
    o_ref[...] = a_ref[...] + b_ref[...]


def pallas_add(a, b):
    orig_shape = a.shape
    c = orig_shape[-1]
    # Flatten to 2D with the channel axis (384 = 3*128) as the lane axis.
    a2 = a.reshape(-1, c)
    b2 = b.reshape(-1, c)
    rows = a2.shape[0]

    elem_bytes = jnp.dtype(a.dtype).itemsize
    cost = pl.CostEstimate(
        flops=rows * c,                      # one add per element
        transcendentals=0,
        bytes_accessed=3 * rows * c * elem_bytes,
    )

    out2 = pl.pallas_call(
        add_kernel,
        out_shape=jax.ShapeDtypeStruct((rows, c), a.dtype),
        in_specs=[
            pl.BlockSpec(memory_space=pltpu.MemorySpace.VMEM),
            pl.BlockSpec(memory_space=pltpu.MemorySpace.VMEM),
        ],
        out_specs=pl.BlockSpec(memory_space=pltpu.MemorySpace.VMEM),
        # Output reuses operand 0's buffer (caller donates it via pallas_add_jit).
        input_output_aliases={0: 0},
        cost_estimate=cost,
    )(a2, b2)

    return out2.reshape(orig_shape)


# Public entry point: donate the first operand so the in/out aliasing is
# realized without a defensive copy around the call.
pallas_add_jit = jax.jit(pallas_add, donate_argnums=(0,))


if __name__ == "__main__":
    key = jax.random.PRNGKey(0)
    k1, k2 = jax.random.split(key)
    # Shapes implied by the module's forward: [1, 14, 14, 384]
    x502 = jax.random.normal(k1, (1, 14, 14, 384), dtype=jnp.float32)
    x516 = jax.random.normal(k2, (1, 14, 14, 384), dtype=jnp.float32)

    # Reference computed BEFORE the donating call (x502 is consumed by donation).
    ref = x502 + x516
    jax.block_until_ready(ref)

    out = pallas_add_jit(x502, x516)
    jax.block_until_ready(out)

    assert out.shape == ref.shape and out.dtype == ref.dtype
    assert jnp.allclose(out, ref, atol=1e-6, rtol=1e-6)

    print("KERNEL_OK")
</pallas_src>

<mosaic_0001>
module attributes {stable_mosaic.version = 11 : i64} {
  func.func @add_kernel(%arg0: memref<196x384xf32, #tpu.memory_space<vmem>>, %arg1: memref<196x384xf32, #tpu.memory_space<vmem>>, %arg2: memref<196x384xf32, #tpu.memory_space<vmem>>) attributes {dimension_semantics = [], scalar_prefetch = 0 : i64, scratch_operands = 0 : i64, tpu.core_type = #tpu.core_type<tc>} {
    %c0 = arith.constant 0 : index
    %c0_0 = arith.constant 0 : index
    %0 = vector.load %arg0[%c0, %c0_0] : memref<196x384xf32, #tpu.memory_space<vmem>>, vector<196x384xf32>
    %c0_1 = arith.constant 0 : index
    %c0_2 = arith.constant 0 : index
    %1 = vector.load %arg1[%c0_1, %c0_2] : memref<196x384xf32, #tpu.memory_space<vmem>>, vector<196x384xf32>
    %2 = arith.addf %0, %1 : vector<196x384xf32>
    %c0_3 = arith.constant 0 : index
    %c0_4 = arith.constant 0 : index
    %3 = vector.load %arg2[%c0_3, %c0_4] : memref<196x384xf32, #tpu.memory_space<vmem>>, vector<196x384xf32>
    tpu.vector_store %arg2[%c0_3, %c0_4], %2 {strides = array<i32>} : memref<196x384xf32, #tpu.memory_space<vmem>>, vector<196x384xf32>,
    return
  }
}

</mosaic_0001>

<bundles_post_ra>
// kernel: pallas_add.1
= control target key start
LH: loop header
LB: loop body
LE: loop exit
PB: predicated region body
PF: predicated region fallthrough
CT: control target
= control target key end

     0   :  { %s1005_s0 = inlined_call_operand.vmem [shape: f32[196,384], index: 0, kind: input, shape index: {}, may-alias: {0,2}]   ;;  %s1006_s1 = inlined_call_operand.vmem [shape: f32[196,384], index: 1, kind: input, shape index: {}]   ;;  %s1007_s2 = inlined_call_operand.vmem [shape: f32[196,384], index: 2, kind: output, shape index: {}, may-alias: {0,2}]  }
   0x1   :  { %v11_v0 = vld [vmem:[%s1005_s0] sm:$0xff]  ;;  %v12_v2 = vld [vmem:[%s1005_s0 + $0x8] sm:$0xff]  ;;  %v13_v5 = vld [vmem:[%s1005_s0 + $0x10] sm:$0xff] }
   0x2   :  { %v86_v1 = vld [vmem:[%s1006_s1] sm:$0xff]  ;;  %v87_v4 = vld [vmem:[%s1006_s1 + $0x8] sm:$0xff]  ;;  %v88_v6 = vld [vmem:[%s1006_s1 + $0x10] sm:$0xff] }
   0x3   :  { %v161_v3 = vadd.f32 %v86_v1, %v11_v0  ;;  %v162_v7 = vadd.f32 %v87_v4, %v12_v2  ;;  %v163_v8 = vadd.f32 %v88_v6, %v13_v5  ;;  %v14_v9 = vld [vmem:[%s1005_s0 + $0x18] sm:$0xff]  ;;  %v15_v11 = vld [vmem:[%s1005_s0 + $0x20] sm:$0xff]  ;;  %v91_v15 = vld [vmem:[%s1006_s1 + $0x28] sm:$0xff] }
   0x4   :  { %v89_v10 = vld [vmem:[%s1006_s1 + $0x18] sm:$0xff]  ;;  %v90_v13 = vld [vmem:[%s1006_s1 + $0x20] sm:$0xff]  ;;  %v92_v19 = vld [vmem:[%s1006_s1 + $0x30] sm:$0xff] }
   0x5   :  { %236 = vst [vmem:[%s1007_s2] sm:$0xff] %v161_v3  ;;  %v164_v12 = vadd.f32 %v89_v10, %v14_v9  ;;  %v165_v16 = vadd.f32 %v90_v13, %v15_v11  ;;  %v93_v22 = vld [vmem:[%s1006_s1 + $0x38] sm:$0xff]  ;;  %v94_v24 = vld [vmem:[%s1006_s1 + $0x40] sm:$0xff]  ;;  %v95_v28 = vld [vmem:[%s1006_s1 + $0x48] sm:$0xff] }
   0x6   :  { %v96_v31 = vld [vmem:[%s1006_s1 + $0x50] sm:$0xff]  ;;  %v97_v33 = vld [vmem:[%s1006_s1 + $0x58] sm:$0xff]  ;;  %v98_v37 = vld [vmem:[%s1006_s1 + $0x60] sm:$0xff] }
   0x7   :  { %v99_v40 = vld [vmem:[%s1006_s1 + $0x68] sm:$0xff]  ;;  %v100_v42 = vld [vmem:[%s1006_s1 + $0x70] sm:$0xff]  ;;  %v101_v46 = vld [vmem:[%s1006_s1 + $0x78] sm:$0xff] }
   0x8   :  { %v102_v49 = vld [vmem:[%s1006_s1 + $0x80] sm:$0xff]  ;;  %v103_v51 = vld [vmem:[%s1006_s1 + $0x88] sm:$0xff]  ;;  %v104_v55 = vld [vmem:[%s1006_s1 + $0x90] sm:$0xff] }
   0x9   :  { %v105_v58 = vld [vmem:[%s1006_s1 + $0x98] sm:$0xff]  ;;  %v106_v60 = vld [vmem:[%s1006_s1 + $0xa0] sm:$0xff]  ;;  %v107_v0 = vld [vmem:[%s1006_s1 + $0xa8] sm:$0xff] }
   0xa   :  { %v108_v3 = vld [vmem:[%s1006_s1 + $0xb0] sm:$0xff]  ;;  %v109_v5 = vld [vmem:[%s1006_s1 + $0xb8] sm:$0xff]  ;;  %v110_v9 = vld [vmem:[%s1006_s1 + $0xc0] sm:$0xff] }
   0xc   :  { %v16_v14 = vld [vmem:[%s1005_s0 + $0x28] sm:$0xff] }
   0xd   :  { %237 = vst [vmem:[%s1007_s2 + $0x8] sm:$0xff] %v162_v7  ;;  %238 = vst [vmem:[%s1007_s2 + $0x10] sm:$0xff] %v163_v8  ;;  %v166_v17 = vadd.f32 %v91_v15, %v16_v14  ;;  %v112_v14 = vld [vmem:[%s1006_s1 + $0xd0] sm:$0xff] }
  0x14   :  { %v17_v18 = vld [vmem:[%s1005_s0 + $0x30] sm:$0xff]  ;;  %v18_v20 = vld [vmem:[%s1005_s0 + $0x38] sm:$0xff] }
  0x15   :  { %239 = vst [vmem:[%s1007_s2 + $0x18] sm:$0xff] %v164_v12  ;;  %v167_v21 = vadd.f32 %v92_v19, %v17_v18  ;;  %v168_v25 = vadd.f32 %v93_v22, %v18_v20  ;;  %v111_v12 = vld [vmem:[%s1006_s1 + $0xc8] sm:$0xff]  ;;  %v113_v18 = vld [vmem:[%s1006_s1 + $0xd8] sm:$0xff] }
  0x1c   :  { %v19_v23 = vld [vmem:[%s1005_s0 + $0x40] sm:$0xff] }
  0x1d   :  { %240 = vst [vmem:[%s1007_s2 + $0x20] sm:$0xff] %v165_v16  ;;  %241 = vst [vmem:[%s1007_s2 + $0x28] sm:$0xff] %v166_v17  ;;  %v169_v26 = vadd.f32 %v94_v24, %v19_v23  ;;  %v115_v23 = vld [vmem:[%s1006_s1 + $0xe8] sm:$0xff] }
  0x24   :  { %v20_v27 = vld [vmem:[%s1005_s0 + $0x48] sm:$0xff]  ;;  %v21_v29 = vld [vmem:[%s1005_s0 + $0x50] sm:$0xff] }
  0x25   :  { %242 = vst [vmem:[%s1007_s2 + $0x30] sm:$0xff] %v167_v21  ;;  %v170_v30 = vadd.f32 %v95_v28, %v20_v27  ;;  %v171_v34 = vadd.f32 %v96_v31, %v21_v29  ;;  %v114_v21 = vld [vmem:[%s1006_s1 + $0xe0] sm:$0xff]  ;;  %v116_v27 = vld [vmem:[%s1006_s1 + $0xf0] sm:$0xff] }
  0x2c   :  { %v22_v32 = vld [vmem:[%s1005_s0 + $0x58] sm:$0xff] }
  0x2d   :  { %243 = vst [vmem:[%s1007_s2 + $0x38] sm:$0xff] %v168_v25  ;;  %244 = vst [vmem:[%s1007_s2 + $0x40] sm:$0xff] %v169_v26  ;;  %v172_v35 = vadd.f32 %v97_v33, %v22_v32  ;;  %v118_v32 = vld [vmem:[%s1006_s1 + $0x100] sm:$0xff] }
  0x34   :  { %v23_v36 = vld [vmem:[%s1005_s0 + $0x60] sm:$0xff]  ;;  %v24_v38 = vld [vmem:[%s1005_s0 + $0x68] sm:$0xff] }
  0x35   :  { %245 = vst [vmem:[%s1007_s2 + $0x48] sm:$0xff] %v170_v30  ;;  %v173_v39 = vadd.f32 %v98_v37, %v23_v36  ;;  %v174_v43 = vadd.f32 %v99_v40, %v24_v38  ;;  %v117_v30 = vld [vmem:[%s1006_s1 + $0xf8] sm:$0xff]  ;;  %v119_v36 = vld [vmem:[%s1006_s1 + $0x108] sm:$0xff] }
  0x3c   :  { %v25_v41 = vld [vmem:[%s1005_s0 + $0x70] sm:$0xff] }
  0x3d   :  { %246 = vst [vmem:[%s1007_s2 + $0x50] sm:$0xff] %v171_v34  ;;  %247 = vst [vmem:[%s1007_s2 + $0x58] sm:$0xff] %v172_v35  ;;  %v175_v44 = vadd.f32 %v100_v42, %v25_v41  ;;  %v121_v41 = vld [vmem:[%s1006_s1 + $0x118] sm:$0xff] }
  0x44   :  { %v26_v45 = vld [vmem:[%s1005_s0 + $0x78] sm:$0xff]  ;;  %v27_v47 = vld [vmem:[%s1005_s0 + $0x80] sm:$0xff] }
  0x45   :  { %248 = vst [vmem:[%s1007_s2 + $0x60] sm:$0xff] %v173_v39  ;;  %v176_v48 = vadd.f32 %v101_v46, %v26_v45  ;;  %v177_v52 = vadd.f32 %v102_v49, %v27_v47  ;;  %v120_v39 = vld [vmem:[%s1006_s1 + $0x110] sm:$0xff]  ;;  %v122_v45 = vld [vmem:[%s1006_s1 + $0x120] sm:$0xff] }
  0x4c   :  { %v28_v50 = vld [vmem:[%s1005_s0 + $0x88] sm:$0xff] }
  0x4d   :  { %249 = vst [vmem:[%s1007_s2 + $0x68] sm:$0xff] %v174_v43  ;;  %250 = vst [vmem:[%s1007_s2 + $0x70] sm:$0xff] %v175_v44  ;;  %v178_v53 = vadd.f32 %v103_v51, %v28_v50  ;;  %v124_v50 = vld [vmem:[%s1006_s1 + $0x130] sm:$0xff] }
  0x54   :  { %v29_v54 = vld [vmem:[%s1005_s0 + $0x90] sm:$0xff]  ;;  %v30_v56 = vld [vmem:[%s1005_s0 + $0x98] sm:$0xff] }
  0x55   :  { %251 = vst [vmem:[%s1007_s2 + $0x78] sm:$0xff] %v176_v48  ;;  %v179_v57 = vadd.f32 %v104_v55, %v29_v54  ;;  %v180_v61 = vadd.f32 %v105_v58, %v30_v56  ;;  %v123_v48 = vld [vmem:[%s1006_s1 + $0x128] sm:$0xff]  ;;  %v125_v54 = vld [vmem:[%s1006_s1 + $0x138] sm:$0xff] }
  0x5c   :  { %v31_v59 = vld [vmem:[%s1005_s0 + $0xa0] sm:$0xff] }
  0x5d   :  { %252 = vst [vmem:[%s1007_s2 + $0x80] sm:$0xff] %v177_v52  ;;  %253 = vst [vmem:[%s1007_s2 + $0x88] sm:$0xff] %v178_v53  ;;  %v181_v62 = vadd.f32 %v106_v60, %v31_v59  ;;  %v127_v59 = vld [vmem:[%s1006_s1 + $0x148] sm:$0xff] }
  0x64   :  { %v32_v63 = vld [vmem:[%s1005_s0 + $0xa8] sm:$0xff]  ;;  %v33_v1 = vld [vmem:[%s1005_s0 + $0xb0] sm:$0xff] }
  0x65   :  { %254 = vst [vmem:[%s1007_s2 + $0x90] sm:$0xff] %v179_v57  ;;  %v182_v2 = vadd.f32 %v107_v0, %v32_v63  ;;  %v183_v6 = vadd.f32 %v108_v3, %v33_v1  ;;  %v126_v57 = vld [vmem:[%s1006_s1 + $0x140] sm:$0xff]  ;;  %v128_v63 = vld [vmem:[%s1006_s1 + $0x150] sm:$0xff] }
  0x6c   :  { %v34_v4 = vld [vmem:[%s1005_s0 + $0xb8] sm:$0xff] }
  0x6d   :  { %255 = vst [vmem:[%s1007_s2 + $0x98] sm:$0xff] %v180_v61  ;;  %256 = vst [vmem:[%s1007_s2 + $0xa0] sm:$0xff] %v181_v62  ;;  %v184_v7 = vadd.f32 %v109_v5, %v34_v4  ;;  %v130_v4 = vld [vmem:[%s1006_s1 + $0x160] sm:$0xff] }
  0x74   :  { %v35_v8 = vld [vmem:[%s1005_s0 + $0xc0] sm:$0xff]  ;;  %v36_v10 = vld [vmem:[%s1005_s0 + $0xc8] sm:$0xff] }
  0x75   :  { %257 = vst [vmem:[%s1007_s2 + $0xa8] sm:$0xff] %v182_v2  ;;  %v185_v11 = vadd.f32 %v110_v9, %v35_v8  ;;  %v186_v15 = vadd.f32 %v111_v12, %v36_v10  ;;  %v129_v2 = vld [vmem:[%s1006_s1 + $0x158] sm:$0xff]  ;;  %v131_v8 = vld [vmem:[%s1006_s1 + $0x168] sm:$0xff] }
  0x7c   :  { %v37_v13 = vld [vmem:[%s1005_s0 + $0xd0] sm:$0xff] }
  0x7d   :  { %258 = vst [vmem:[%s1007_s2 + $0xb0] sm:$0xff] %v183_v6  ;;  %259 = vst [vmem:[%s1007_s2 + $0xb8] sm:$0xff] %v184_v7  ;;  %v187_v16 = vadd.f32 %v112_v14, %v37_v13  ;;  %v133_v13 = vld [vmem:[%s1006_s1 + $0x178] sm:$0xff] }
  0x84   :  { %v38_v17 = vld [vmem:[%s1005_s0 + $0xd8] sm:$0xff]  ;;  %v39_v19 = vld [vmem:[%s1005_s0 + $0xe0] sm:$0xff] }
  0x85   :  { %260 = vst [vmem:[%s1007_s2 + $0xc0] sm:$0xff] %v185_v11  ;;  %v188_v20 = vadd.f32 %v113_v18, %v38_v17  ;;  %v189_v24 = vadd.f32 %v114_v21, %v39_v19  ;;  %v132_v11 = vld [vmem:[%s1006_s1 + $0x170] sm:$0xff]  ;;  %v134_v17 = vld [vmem:[%s1006_s1 + $0x180] sm:$0xff] }
  0x8c   :  { %v40_v22 = vld [vmem:[%s1005_s0 + $0xe8] sm:$0xff] }
  0x8d   :  { %261 = vst [vmem:[%s1007_s2 + $0xc8] sm:$0xff] %v186_v15  ;;  %262 = vst [vmem:[%s1007_s2 + $0xd0] sm:$0xff] %v187_v16  ;;  %v190_v25 = vadd.f32 %v115_v23, %v40_v22  ;;  %v136_v22 = vld [vmem:[%s1006_s1 + $0x190] sm:$0xff] }
  0x94   :  { %v41_v26 = vld [vmem:[%s1005_s0 + $0xf0] sm:$0xff]  ;;  %v42_v28 = vld [vmem:[%s1005_s0 + $0xf8] sm:$0xff] }
  0x95   :  { %263 = vst [vmem:[%s1007_s2 + $0xd8] sm:$0xff] %v188_v20  ;;  %v191_v29 = vadd.f32 %v116_v27, %v41_v26  ;;  %v192_v33 = vadd.f32 %v117_v30, %v42_v28  ;;  %v135_v20 = vld [vmem:[%s1006_s1 + $0x188] sm:$0xff]  ;;  %v137_v26 = vld [vmem:[%s1006_s1 + $0x198] sm:$0xff] }
  0x9c   :  { %v43_v31 = vld [vmem:[%s1005_s0 + $0x100] sm:$0xff] }
  0x9d   :  { %264 = vst [vmem:[%s1007_s2 + $0xe0] sm:$0xff] %v189_v24  ;;  %265 = vst [vmem:[%s1007_s2 + $0xe8] sm:$0xff] %v190_v25  ;;  %v193_v34 = vadd.f32 %v118_v32, %v43_v31  ;;  %v139_v31 = vld [vmem:[%s1006_s1 + $0x1a8] sm:$0xff] }
  0xa4   :  { %v44_v35 = vld [vmem:[%s1005_s0 + $0x108] sm:$0xff]  ;;  %v45_v37 = vld [vmem:[%s1005_s0 + $0x110] sm:$0xff] }
  0xa5   :  { %266 = vst [vmem:[%s1007_s2 + $0xf0] sm:$0xff] %v191_v29  ;;  %v194_v38 = vadd.f32 %v119_v36, %v44_v35  ;;  %v195_v42 = vadd.f32 %v120_v39, %v45_v37  ;;  %v138_v29 = vld [vmem:[%s1006_s1 + $0x1a0] sm:$0xff]  ;;  %v140_v35 = vld [vmem:[%s1006_s1 + $0x1b0] sm:$0xff] }
  0xac   :  { %v46_v40 = vld [vmem:[%s1005_s0 + $0x118] sm:$0xff] }
  0xad   :  { %267 = vst [vmem:[%s1007_s2 + $0xf8] sm:$0xff] %v192_v33  ;;  %268 = vst [vmem:[%s1007_s2 + $0x100] sm:$0xff] %v193_v34  ;;  %v196_v43 = vadd.f32 %v121_v41, %v46_v40  ;;  %v142_v40 = vld [vmem:[%s1006_s1 + $0x1c0] sm:$0xff] }
  0xb4   :  { %v47_v44 = vld [vmem:[%s1005_s0 + $0x120] sm:$0xff]  ;;  %v48_v46 = vld [vmem:[%s1005_s0 + $0x128] sm:$0xff] }
  0xb5   :  { %269 = vst [vmem:[%s1007_s2 + $0x108] sm:$0xff] %v194_v38  ;;  %v197_v47 = vadd.f32 %v122_v45, %v47_v44  ;;  %v198_v51 = vadd.f32 %v123_v48, %v48_v46  ;;  %v141_v38 = vld [vmem:[%s1006_s1 + $0x1b8] sm:$0xff]  ;;  %v143_v44 = vld [vmem:[%s1006_s1 + $0x1c8] sm:$0xff] }
  0xbc   :  { %v49_v49 = vld [vmem:[%s1005_s0 + $0x130] sm:$0xff] }
  0xbd   :  { %270 = vst [vmem:[%s1007_s2 + $0x110] sm:$0xff] %v195_v42  ;;  %271 = vst [vmem:[%s1007_s2 + $0x118] sm:$0xff] %v196_v43  ;;  %v199_v52 = vadd.f32 %v124_v50, %v49_v49  ;;  %v145_v49 = vld [vmem:[%s1006_s1 + $0x1d8] sm:$0xff] }
  0xc4   :  { %v50_v53 = vld [vmem:[%s1005_s0 + $0x138] sm:$0xff]  ;;  %v51_v55 = vld [vmem:[%s1005_s0 + $0x140] sm:$0xff] }
  0xc5   :  { %272 = vst [vmem:[%s1007_s2 + $0x120] sm:$0xff] %v197_v47  ;;  %v200_v56 = vadd.f32 %v125_v54, %v50_v53  ;;  %v201_v60 = vadd.f32 %v126_v57, %v51_v55  ;;  %v144_v47 = vld [vmem:[%s1006_s1 + $0x1d0] sm:$0xff]  ;;  %v146_v53 = vld [vmem:[%s1006_s1 + $0x1e0] sm:$0xff] }
  0xcc   :  { %v52_v58 = vld [vmem:[%s1005_s0 + $0x148] sm:$0xff] }
  0xcd   :  { %273 = vst [vmem:[%s1007_s2 + $0x128] sm:$0xff] %v198_v51  ;;  %274 = vst [vmem:[%s1007_s2 + $0x130] sm:$0xff] %v199_v52  ;;  %v202_v61 = vadd.f32 %v127_v59, %v52_v58  ;;  %v148_v58 = vld [vmem:[%s1006_s1 + $0x1f0] sm:$0xff] }
  0xd4   :  { %v53_v62 = vld [vmem:[%s1005_s0 + $0x150] sm:$0xff]  ;;  %v54_v0 = vld [vmem:[%s1005_s0 + $0x158] sm:$0xff] }
  0xd5   :  { %275 = vst [vmem:[%s1007_s2 + $0x138] sm:$0xff] %v200_v56  ;;  %v203_v1 = vadd.f32 %v128_v63, %v53_v62  ;;  %v204_v5 = vadd.f32 %v129_v2, %v54_v0  ;;  %v147_v56 = vld [vmem:[%s1006_s1 + $0x1e8] sm:$0xff]  ;;  %v149_v62 = vld [vmem:[%s1006_s1 + $0x1f8] sm:$0xff] }
  0xdc   :  { %v55_v3 = vld [vmem:[%s1005_s0 + $0x160] sm:$0xff] }
  0xdd   :  { %276 = vst [vmem:[%s1007_s2 + $0x140] sm:$0xff] %v201_v60  ;;  %277 = vst [vmem:[%s1007_s2 + $0x148] sm:$0xff] %v202_v61  ;;  %v205_v6 = vadd.f32 %v130_v4, %v55_v3  ;;  %v151_v3 = vld [vmem:[%s1006_s1 + $0x208] sm:$0xff] }
  0xe4   :  { %v56_v7 = vld [vmem:[%s1005_s0 + $0x168] sm:$0xff]  ;;  %v57_v9 = vld [vmem:[%s1005_s0 + $0x170] sm:$0xff] }
  0xe5   :  { %278 = vst [vmem:[%s1007_s2 + $0x150] sm:$0xff] %v203_v1  ;;  %v206_v10 = vadd.f32 %v131_v8, %v56_v7  ;;  %v207_v14 = vadd.f32 %v132_v11, %v57_v9  ;;  %v150_v1 = vld [vmem:[%s1006_s1 + $0x200] sm:$0xff]  ;;  %v152_v7 = vld [vmem:[%s1006_s1 + $0x210] sm:$0xff] }
  0xec   :  { %v58_v12 = vld [vmem:[%s1005_s0 + $0x178] sm:$0xff] }
  0xed   :  { %279 = vst [vmem:[%s1007_s2 + $0x158] sm:$0xff] %v204_v5  ;;  %280 = vst [vmem:[%s1007_s2 + $0x160] sm:$0xff] %v205_v6  ;;  %v208_v15 = vadd.f32 %v133_v13, %v58_v12  ;;  %v154_v12 = vld [vmem:[%s1006_s1 + $0x220] sm:$0xff] }
  0xf4   :  { %v59_v16 = vld [vmem:[%s1005_s0 + $0x180] sm:$0xff]  ;;  %v60_v18 = vld [vmem:[%s1005_s0 + $0x188] sm:$0xff] }
  0xf5   :  { %281 = vst [vmem:[%s1007_s2 + $0x168] sm:$0xff] %v206_v10  ;;  %v209_v19 = vadd.f32 %v134_v17, %v59_v16  ;;  %v210_v23 = vadd.f32 %v135_v20, %v60_v18  ;;  %v153_v10 = vld [vmem:[%s1006_s1 + $0x218] sm:$0xff]  ;;  %v155_v16 = vld [vmem:[%s1006_s1 + $0x228] sm:$0xff] }
  0xfc   :  { %v61_v21 = vld [vmem:[%s1005_s0 + $0x190] sm:$0xff] }
  0xfd   :  { %282 = vst [vmem:[%s1007_s2 + $0x170] sm:$0xff] %v207_v14  ;;  %283 = vst [vmem:[%s1007_s2 + $0x178] sm:$0xff] %v208_v15  ;;  %v211_v24 = vadd.f32 %v136_v22, %v61_v21  ;;  %v157_v21 = vld [vmem:[%s1006_s1 + $0x238] sm:$0xff] }
 0x104   :  { %v62_v25 = vld [vmem:[%s1005_s0 + $0x198] sm:$0xff]  ;;  %v63_v27 = vld [vmem:[%s1005_s0 + $0x1a0] sm:$0xff] }
 0x105   :  { %284 = vst [vmem:[%s1007_s2 + $0x180] sm:$0xff] %v209_v19  ;;  %v212_v28 = vadd.f32 %v137_v26, %v62_v25  ;;  %v213_v32 = vadd.f32 %v138_v29, %v63_v27  ;;  %v156_v19 = vld [vmem:[%s1006_s1 + $0x230] sm:$0xff]  ;;  %v158_v25 = vld [vmem:[%s1006_s1 + $0x240] sm:$0xf] }
 0x10c   :  { %v64_v30 = vld [vmem:[%s1005_s0 + $0x1a8] sm:$0xff] }
 0x10d   :  { %285 = vst [vmem:[%s1007_s2 + $0x188] sm:$0xff] %v210_v23  ;;  %286 = vst [vmem:[%s1007_s2 + $0x190] sm:$0xff] %v211_v24  ;;  %v214_v33 = vadd.f32 %v139_v31, %v64_v30  ;;  %v160_v30 = vld [vmem:[%s1006_s1 + $0x250] sm:$0xf] }
 0x114   :  { %v65_v34 = vld [vmem:[%s1005_s0 + $0x1b0] sm:$0xff]  ;;  %v66_v36 = vld [vmem:[%s1005_s0 + $0x1b8] sm:$0xff] }
 0x115   :  { %287 = vst [vmem:[%s1007_s2 + $0x198] sm:$0xff] %v212_v28  ;;  %v215_v37 = vadd.f32 %v140_v35, %v65_v34  ;;  %v216_v41 = vadd.f32 %v141_v38, %v66_v36  ;;  %v159_v28 = vld [vmem:[%s1006_s1 + $0x248] sm:$0xf] }
 0x11c   :  { %v67_v39 = vld [vmem:[%s1005_s0 + $0x1c0] sm:$0xff] }
 0x11d   :  { %288 = vst [vmem:[%s1007_s2 + $0x1a0] sm:$0xff] %v213_v32  ;;  %289 = vst [vmem:[%s1007_s2 + $0x1a8] sm:$0xff] %v214_v33  ;;  %v217_v42 = vadd.f32 %v142_v40, %v67_v39 }
 0x124   :  { %v68_v43 = vld [vmem:[%s1005_s0 + $0x1c8] sm:$0xff]  ;;  %v69_v45 = vld [vmem:[%s1005_s0 + $0x1d0] sm:$0xff] }
 0x125   :  { %290 = vst [vmem:[%s1007_s2 + $0x1b0] sm:$0xff] %v215_v37  ;;  %v218_v46 = vadd.f32 %v143_v44, %v68_v43  ;;  %v219_v50 = vadd.f32 %v144_v47, %v69_v45 }
 0x12c   :  { %v70_v48 = vld [vmem:[%s1005_s0 + $0x1d8] sm:$0xff] }
 0x12d   :  { %291 = vst [vmem:[%s1007_s2 + $0x1b8] sm:$0xff] %v216_v41  ;;  %292 = vst [vmem:[%s1007_s2 + $0x1c0] sm:$0xff] %v217_v42  ;;  %v220_v51 = vadd.f32 %v145_v49, %v70_v48 }
 0x134   :  { %v71_v52 = vld [vmem:[%s1005_s0 + $0x1e0] sm:$0xff]  ;;  %v72_v54 = vld [vmem:[%s1005_s0 + $0x1e8] sm:$0xff] }
 0x135   :  { %293 = vst [vmem:[%s1007_s2 + $0x1c8] sm:$0xff] %v218_v46  ;;  %v221_v55 = vadd.f32 %v146_v53, %v71_v52  ;;  %v222_v59 = vadd.f32 %v147_v56, %v72_v54 }
 0x13c   :  { %v73_v57 = vld [vmem:[%s1005_s0 + $0x1f0] sm:$0xff] }
 0x13d   :  { %294 = vst [vmem:[%s1007_s2 + $0x1d0] sm:$0xff] %v219_v50  ;;  %295 = vst [vmem:[%s1007_s2 + $0x1d8] sm:$0xff] %v220_v51  ;;  %v223_v60 = vadd.f32 %v148_v58, %v73_v57 }
 0x144   :  { %v74_v61 = vld [vmem:[%s1005_s0 + $0x1f8] sm:$0xff]  ;;  %v75_v63 = vld [vmem:[%s1005_s0 + $0x200] sm:$0xff] }
 0x145   :  { %296 = vst [vmem:[%s1007_s2 + $0x1e0] sm:$0xff] %v221_v55  ;;  %v224_v0 = vadd.f32 %v149_v62, %v74_v61  ;;  %v225_v4 = vadd.f32 %v150_v1, %v75_v63 }
 0x14c   :  { %v76_v2 = vld [vmem:[%s1005_s0 + $0x208] sm:$0xff] }
 0x14d   :  { %297 = vst [vmem:[%s1007_s2 + $0x1e8] sm:$0xff] %v222_v59  ;;  %298 = vst [vmem:[%s1007_s2 + $0x1f0] sm:$0xff] %v223_v60  ;;  %v226_v5 = vadd.f32 %v151_v3, %v76_v2 }
 0x154   :  { %v77_v6 = vld [vmem:[%s1005_s0 + $0x210] sm:$0xff]  ;;  %v78_v8 = vld [vmem:[%s1005_s0 + $0x218] sm:$0xff] }
 0x155   :  { %299 = vst [vmem:[%s1007_s2 + $0x1f8] sm:$0xff] %v224_v0  ;;  %v227_v9 = vadd.f32 %v152_v7, %v77_v6  ;;  %v228_v13 = vadd.f32 %v153_v10, %v78_v8 }
 0x15c   :  { %v79_v11 = vld [vmem:[%s1005_s0 + $0x220] sm:$0xff] }
 0x15d   :  { %300 = vst [vmem:[%s1007_s2 + $0x200] sm:$0xff] %v225_v4  ;;  %301 = vst [vmem:[%s1007_s2 + $0x208] sm:$0xff] %v226_v5  ;;  %v229_v14 = vadd.f32 %v154_v12, %v79_v11 }
 0x164   :  { %v80_v15 = vld [vmem:[%s1005_s0 + $0x228] sm:$0xff]  ;;  %v81_v17 = vld [vmem:[%s1005_s0 + $0x230] sm:$0xff] }
 0x165   :  { %302 = vst [vmem:[%s1007_s2 + $0x210] sm:$0xff] %v227_v9  ;;  %v230_v18 = vadd.f32 %v155_v16, %v80_v15  ;;  %v231_v22 = vadd.f32 %v156_v19, %v81_v17 }
 0x16c   :  { %v82_v20 = vld [vmem:[%s1005_s0 + $0x238] sm:$0xff] }
 0x16d   :  { %303 = vst [vmem:[%s1007_s2 + $0x218] sm:$0xff] %v228_v13  ;;  %304 = vst [vmem:[%s1007_s2 + $0x220] sm:$0xff] %v229_v14  ;;  %v232_v23 = vadd.f32 %v157_v21, %v82_v20 }
 0x174   :  { %v83_v24 = vld [vmem:[%s1005_s0 + $0x240] sm:$0xf]  ;;  %v84_v26 = vld [vmem:[%s1005_s0 + $0x248] sm:$0xf] }
 0x175   :  { %305 = vst [vmem:[%s1007_s2 + $0x228] sm:$0xff] %v230_v18  ;;  %v233_v27 = vadd.f32 %v158_v25, %v83_v24  ;;  %v234_v31 = vadd.f32 %v159_v28, %v84_v26 }
 0x17c   :  { %v85_v29 = vld [vmem:[%s1005_s0 + $0x250] sm:$0xf] }
 0x17d   :  { %306 = vst [vmem:[%s1007_s2 + $0x230] sm:$0xff] %v231_v22  ;;  %307 = vst [vmem:[%s1007_s2 + $0x238] sm:$0xff] %v232_v23  ;;  %v235_v32 = vadd.f32 %v160_v30, %v85_v29 }
 0x17e   :  { %308 = vst [vmem:[%s1007_s2 + $0x240] sm:$0xf] %v233_v27  ;;  %309 = vst [vmem:[%s1007_s2 + $0x248] sm:$0xf] %v234_v31 }
 0x17f   :  { %310 = vst [vmem:[%s1007_s2 + $0x250] sm:$0xf] %v235_v32 }

</bundles_post_ra>
